<compile_context>
chip_gen: v7x
topology: tpu7x:2x2x1
jax: 0.10.0
libtpu: 0.0.40
codegen_flags: <defaults>
</compile_context>

<pallas_src>
import functools

import jax
import jax.numpy as jnp
from jax import lax
from jax.experimental import pallas as pl
from jax.experimental.pallas import tpu as pltpu

NUM_STEPS = 20   # inner GD iterations performed by selection.optimizer.run
LR = 0.1         # inner-loop learning rate


# ---------------------------------------------------------------------------
# Pass 1: Gram statistics, tiled reduction over N (accumulate into outputs).
# ---------------------------------------------------------------------------
def _gram_kernel(x_ref, y_ref, a_ref, c_ref, *, inv_n):
    @pl.when(pl.program_id(0) == 0)
    def _init():
        a_ref[...] = jnp.zeros_like(a_ref)
        c_ref[...] = jnp.zeros_like(c_ref)

    X = x_ref[...]            # (TN, D)  float32
    y = y_ref[...]            # (1, TN)  float32, lane-major row

    # Accumulate UNscaled statistics (scale deferred to the finalize step).
    # A += X^T X  (contract over the N tile; no explicit transpose)
    a_ref[...] += lax.dot_general(
        X, X, (((0,), (0,)), ((), ())),
        preferred_element_type=jnp.float32)
    # c += y X  -> (1, D)
    c_ref[...] += jnp.dot(y, X, preferred_element_type=jnp.float32)

    @pl.when(pl.program_id(0) == pl.num_programs(0) - 1)
    def _finalize():
        a_ref[...] *= inv_n
        c_ref[...] *= inv_n


# ---------------------------------------------------------------------------
# Pass 2: batched inner GD solve on the (D,D) Gram matrix, lane-major vectors.
# ---------------------------------------------------------------------------
def _gd_kernel(a_ref, c_ref, theta_ref, w0_ref, w_out_ref, val_ref):
    A = a_ref[...]                         # (D, D)
    c = c_ref[...]                         # (1, D)
    reg = jnp.exp(theta_ref[...])          # (TB, D)  EUP exp, full lane width
    W = w0_ref[...]                        # (TB, D)
    tb, D = W.shape

    # Precomputed-affine recurrence:
    #   W - LR*(W@A - c + reg*W) == damp*W + W@M + lr_c
    # Constants hoisted once; per step only {mul, add, add} follow the matmul.
    M = -LR * A                                            # (D, D)
    damp = 1.0 - LR * reg                                  # (TB, D)
    lr_c = pl.broadcast_to(LR * c, (tb, D))                # hoisted broadcast

    def gd_step(_, W):
        return damp * W + jnp.dot(W, M, preferred_element_type=jnp.float32) + lr_c

    W = lax.fori_loop(0, NUM_STEPS, gd_step, W, unroll=True)

    # g(theta, w) - 0.5*yty = 0.5 w^T A w - c^T w + 0.5 sum(reg w^2)
    # (single fused cross-lane reduction; 0.5*yty is added in the wrapper)
    WA = jnp.dot(W, A, preferred_element_type=jnp.float32)          # (TB, D)
    val = jnp.sum((0.5 * (WA + reg * W) - c) * W, axis=-1, keepdims=True)

    w_out_ref[...] = W.astype(w_out_ref.dtype)
    val_ref[...] = val.astype(val_ref.dtype)

    # TODO(synk): ArgMinOp.backward (implicit-function correction via
    # linear_solver/linear_op and dual-variable warm start) is backward-pass
    # machinery and is not part of this forward kernel.


# ---------------------------------------------------------------------------
# Wrapper: returns (opt_lower_var, val) per candidate, like Selection.forward.
# ---------------------------------------------------------------------------
def selection_forward(X, y, theta, w0, *, tn=None, tb=None):
    N, D = X.shape
    B = theta.shape[0]
    if y.ndim == 1:
        y = y[None, :]
    inv_n = 1.0 / float(N)

    # N-tile: large tiles reach ~85% of HBM roofline; at demo size this is a
    # single block (grid of length 1), which also minimizes launch overhead.
    if tn is None:
        tn = min(N, 1024)
    # Batch tile: wide to fill the MXU, but keep >= 2 tiles so the "parallel"
    # batch axis occupies both TensorCores on v7x.
    if tb is None:
        tb = B
        for cand in (512, 256, 128):
            if B % cand == 0 and B // cand >= 2:
                tb = cand
                break
    assert N % tn == 0, "N must be divisible by tn (pad X/y or change tn)"
    assert B % tb == 0, "B must be divisible by tb (pad theta/w0 or change tb)"

    # ---- Pass 1: Gram statistics (streaming over N, HBM-BW bound at scale) --
    gram_cost = pl.CostEstimate(
        flops=2 * N * D * D + 2 * N * D,
        transcendentals=0,
        bytes_accessed=4 * (N * D + N + D * D + D))

    A, c = pl.pallas_call(
        functools.partial(_gram_kernel, inv_n=inv_n),
        out_shape=(
            jax.ShapeDtypeStruct((D, D), jnp.float32),
            jax.ShapeDtypeStruct((1, D), jnp.float32),
        ),
        grid=(N // tn,),
        in_specs=[
            pl.BlockSpec((tn, D), lambda n: (n, 0)),
            pl.BlockSpec((1, tn), lambda n: (0, n)),
        ],
        out_specs=(
            pl.BlockSpec((D, D), lambda n: (0, 0)),
            pl.BlockSpec((1, D), lambda n: (0, 0)),
        ),
        compiler_params=pltpu.CompilerParams(
            dimension_semantics=("arbitrary",)),
        cost_estimate=gram_cost,
    )(X, y)

    # yty is a per-problem scalar: compute in XLA, fold into val after pass 2
    # (avoids a cross-lane reduce + masked (1,1) store inside pass 1).
    yty = jnp.sum(y * y) * inv_n

    # ---- Pass 2: batched GD over candidates, parallel grid over batch tiles -
    # Note: A/c are constant across the batch grid; at demo D (=128) their VMEM
    # footprint is negligible, so default double-buffering is left as-is.
    w_opt, val = pl.pallas_call(
        _gd_kernel,
        out_shape=(
            jax.ShapeDtypeStruct((B, D), jnp.float32),
            jax.ShapeDtypeStruct((B, 1), jnp.float32),
        ),
        grid=(B // tb,),
        in_specs=[
            pl.BlockSpec((D, D), lambda b: (0, 0)),
            pl.BlockSpec((1, D), lambda b: (0, 0)),
            pl.BlockSpec((tb, D), lambda b: (b, 0)),
            pl.BlockSpec((tb, D), lambda b: (b, 0)),
        ],
        out_specs=(
            pl.BlockSpec((tb, D), lambda b: (b, 0)),
            pl.BlockSpec((tb, 1), lambda b: (b, 0)),
        ),
        compiler_params=pltpu.CompilerParams(
            dimension_semantics=("parallel",)),
    )(A, c, theta, w0)

    return w_opt, val[:, 0] + 0.5 * yty


# ---------------------------------------------------------------------------
# Pure-JAX reference of the same inner solve (residual form, for correctness).
# ---------------------------------------------------------------------------
def selection_forward_ref(X, y, theta, w0):
    n = X.shape[0]
    reg = jnp.exp(theta)                   # (B, D)
    W = w0                                 # (B, D)
    for _ in range(NUM_STEPS):
        R = W @ X.T - y                    # (B, N)
        grad = (R @ X) / n + reg * W
        W = W - LR * grad
    R = W @ X.T - y
    val = 0.5 * jnp.sum(R * R, axis=-1) / n + 0.5 * jnp.sum(reg * W * W, axis=-1)
    return W, val


if __name__ == "__main__":
    # N samples x D features, B candidate (theta, w0) pairs evaluated at once.
    N, D, B = 512, 128, 256

    key = jax.random.PRNGKey(0)
    k_x, k_w_true, k_noise, k_theta, k_w0 = jax.random.split(key, 5)

    X = jax.random.normal(k_x, (N, D), dtype=jnp.float32)
    w_true = jax.random.normal(k_w_true, (D,), dtype=jnp.float32)
    y = (X @ w_true
         + 0.01 * jax.random.normal(k_noise, (N,), dtype=jnp.float32))[None, :]  # (1, N)

    theta = 0.1 * jax.random.normal(k_theta, (B, D), dtype=jnp.float32)   # upper vars
    w0 = 0.01 * jax.random.normal(k_w0, (B, D), dtype=jnp.float32)        # init lower vars

    w_opt, val = selection_forward(X, y, theta, w0)
    jax.block_until_ready((w_opt, val))

    w_ref, val_ref = selection_forward_ref(X, y, theta, w0)
    assert jnp.allclose(w_opt, w_ref, atol=1e-3, rtol=1e-3), "lower var mismatch"
    assert jnp.allclose(val, val_ref, atol=1e-3, rtol=1e-3), "objective value mismatch"

    print("KERNEL_OK")
</pallas_src>

<mosaic_0001>
module attributes {stable_mosaic.version = 11 : i64} {
  func.func @_gram_kernel(%arg0: i32, %arg1: memref<512x128xf32, #tpu.memory_space<vmem>>, %arg2: memref<1x512xf32, #tpu.memory_space<vmem>>, %arg3: memref<128x128xf32, #tpu.memory_space<vmem>>, %arg4: memref<1x128xf32, #tpu.memory_space<vmem>>) attributes {dimension_semantics = [#tpu.dimension_semantics<arbitrary>], iteration_bounds = array<i64: 1>, scalar_prefetch = 0 : i64, scratch_operands = 0 : i64, tpu.core_type = #tpu.core_type<tc>, window_params = [{transform_indices = @transform_0, window_bounds = array<i64: 512, 128>}, {transform_indices = @transform_1, window_bounds = array<i64: 1, 512>}, {pipeline_mode = #tpu.pipeline_mode<synchronous>, transform_indices = @transform_2, window_bounds = array<i64: 128, 128>}, {pipeline_mode = #tpu.pipeline_mode<synchronous>, transform_indices = @transform_3, window_bounds = array<i64: 1, 128>}]} {
    %c0_i32 = arith.constant 0 : i32
    %0 = arith.cmpi eq, %arg0, %c0_i32 : i32
    %1 = arith.extui %0 : i1 to i32
    %c0_i32_0 = arith.constant 0 : i32
    %2 = arith.cmpi ne, %1, %c0_i32_0 : i32
    scf.if %2 {
      %cst_15 = arith.constant 0.000000e+00 : f32
      %16 = vector.broadcast %cst_15 : f32 to vector<128x128xf32>
      %c0_16 = arith.constant 0 : index
      %c0_17 = arith.constant 0 : index
      %17 = vector.load %arg3[%c0_16, %c0_17] : memref<128x128xf32, #tpu.memory_space<vmem>>, vector<128x128xf32>
      tpu.vector_store %arg3[%c0_16, %c0_17], %16 {strides = array<i32>} : memref<128x128xf32, #tpu.memory_space<vmem>>, vector<128x128xf32>,
      %cst_18 = arith.constant 0.000000e+00 : f32
      %18 = vector.broadcast %cst_18 : f32 to vector<1x128xf32>
      %c0_19 = arith.constant 0 : index
      %c0_20 = arith.constant 0 : index
      %19 = vector.load %arg4[%c0_19, %c0_20] : memref<1x128xf32, #tpu.memory_space<vmem>>, vector<1x128xf32>
      tpu.vector_store %arg4[%c0_19, %c0_20], %18 {strides = array<i32>} : memref<1x128xf32, #tpu.memory_space<vmem>>, vector<1x128xf32>,
    } else {
    }
    %c0 = arith.constant 0 : index
    %c0_1 = arith.constant 0 : index
    %3 = vector.load %arg1[%c0, %c0_1] : memref<512x128xf32, #tpu.memory_space<vmem>>, vector<512x128xf32>
    %c0_2 = arith.constant 0 : index
    %c0_3 = arith.constant 0 : index
    %4 = vector.load %arg2[%c0_2, %c0_3] : memref<1x512xf32, #tpu.memory_space<vmem>>, vector<1x512xf32>
    %c0_4 = arith.constant 0 : index
    %c0_5 = arith.constant 0 : index
    %5 = vector.load %arg3[%c0_4, %c0_5] : memref<128x128xf32, #tpu.memory_space<vmem>>, vector<128x128xf32>
    %cst = arith.constant dense<0.000000e+00> : vector<128x128xf32>
    %6 = tpu.matmul %3, %3, %cst {dimension_numbers = #tpu.dot_dimension_numbers<[0], [0], [1], [1], [0, 1, 1, 1], [], []>} : vector<512x128xf32>, vector<512x128xf32>, vector<128x128xf32> -> vector<128x128xf32>
    %7 = arith.addf %5, %6 : vector<128x128xf32>
    %c0_6 = arith.constant 0 : index
    %c0_7 = arith.constant 0 : index
    %8 = vector.load %arg3[%c0_6, %c0_7] : memref<128x128xf32, #tpu.memory_space<vmem>>, vector<128x128xf32>
    tpu.vector_store %arg3[%c0_6, %c0_7], %7 {strides = array<i32>} : memref<128x128xf32, #tpu.memory_space<vmem>>, vector<128x128xf32>,
    %c0_8 = arith.constant 0 : index
    %c0_9 = arith.constant 0 : index
    %9 = vector.load %arg4[%c0_8, %c0_9] : memref<1x128xf32, #tpu.memory_space<vmem>>, vector<1x128xf32>
    %cst_10 = arith.constant dense<0.000000e+00> : vector<1x128xf32>
    %10 = tpu.matmul %4, %3, %cst_10 {dimension_numbers = #tpu.dot_dimension_numbers<[1], [0], [0], [1], [0, 0, 1, 1], [], []>} : vector<1x512xf32>, vector<512x128xf32>, vector<1x128xf32> -> vector<1x128xf32>
    %11 = arith.addf %9, %10 : vector<1x128xf32>
    %c0_11 = arith.constant 0 : index
    %c0_12 = arith.constant 0 : index
    %12 = vector.load %arg4[%c0_11, %c0_12] : memref<1x128xf32, #tpu.memory_space<vmem>>, vector<1x128xf32>
    tpu.vector_store %arg4[%c0_11, %c0_12], %11 {strides = array<i32>} : memref<1x128xf32, #tpu.memory_space<vmem>>, vector<1x128xf32>,
    %c0_i32_13 = arith.constant 0 : i32
    %13 = arith.cmpi eq, %arg0, %c0_i32_13 : i32
    %14 = arith.extui %13 : i1 to i32
    %c0_i32_14 = arith.constant 0 : i32
    %15 = arith.cmpi ne, %14, %c0_i32_14 : i32
    scf.if %15 {
      %c0_15 = arith.constant 0 : index
      %c0_16 = arith.constant 0 : index
      %16 = vector.load %arg3[%c0_15, %c0_16] : memref<128x128xf32, #tpu.memory_space<vmem>>, vector<128x128xf32>
      %cst_17 = arith.constant 0.001953125 : f32
      %17 = vector.broadcast %cst_17 : f32 to vector<128x128xf32>
      %18 = arith.mulf %16, %17 : vector<128x128xf32>
      %c0_18 = arith.constant 0 : index
      %c0_19 = arith.constant 0 : index
      %19 = vector.load %arg3[%c0_18, %c0_19] : memref<128x128xf32, #tpu.memory_space<vmem>>, vector<128x128xf32>
      tpu.vector_store %arg3[%c0_18, %c0_19], %18 {strides = array<i32>} : memref<128x128xf32, #tpu.memory_space<vmem>>, vector<128x128xf32>,
      %c0_20 = arith.constant 0 : index
      %c0_21 = arith.constant 0 : index
      %20 = vector.load %arg4[%c0_20, %c0_21] : memref<1x128xf32, #tpu.memory_space<vmem>>, vector<1x128xf32>
      %cst_22 = arith.constant 0.001953125 : f32
      %21 = vector.broadcast %cst_22 : f32 to vector<1x128xf32>
      %22 = arith.mulf %20, %21 : vector<1x128xf32>
      %c0_23 = arith.constant 0 : index
      %c0_24 = arith.constant 0 : index
      %23 = vector.load %arg4[%c0_23, %c0_24] : memref<1x128xf32, #tpu.memory_space<vmem>>, vector<1x128xf32>
      tpu.vector_store %arg4[%c0_23, %c0_24], %22 {strides = array<i32>} : memref<1x128xf32, #tpu.memory_space<vmem>>, vector<1x128xf32>,
    } else {
    }
    return
  }
  func.func @transform_0(%arg0: i32) -> (i32, i32) {
    %c0_i32 = arith.constant 0 : i32
    %c0_i32_0 = arith.constant 0 : i32
    return %arg0, %c0_i32 : i32, i32
  }
  func.func @transform_1(%arg0: i32) -> (i32, i32) {
    %c0_i32 = arith.constant 0 : i32
    %c0_i32_0 = arith.constant 0 : i32
    return %c0_i32, %arg0 : i32, i32
  }
  func.func @transform_2(%arg0: i32) -> (i32, i32) {
    %c0_i32 = arith.constant 0 : i32
    %c0_i32_0 = arith.constant 0 : i32
    %c0_i32_1 = arith.constant 0 : i32
    return %c0_i32, %c0_i32_0 : i32, i32
  }
  func.func @transform_3(%arg0: i32) -> (i32, i32) {
    %c0_i32 = arith.constant 0 : i32
    %c0_i32_0 = arith.constant 0 : i32
    %c0_i32_1 = arith.constant 0 : i32
    return %c0_i32, %c0_i32_0 : i32, i32
  }
}

</mosaic_0001>

<bundles_post_ra>
// kernel: tpu_custom_call.1
= control target key start
LH: loop header
LB: loop body
LE: loop exit
PB: predicated region body
PF: predicated region fallthrough
CT: control target
= control target key end

     0   :  { %9 = vsyncpa [#allocation3], 0  ;;  %s1861_s0 = inlined_call_operand.hbm [shape: f32[512,128], index: 0, kind: input, shape index: {}]   ;;  %s1862_s1 = inlined_call_operand.hbm [shape: f32[1,512], index: 1, kind: input, shape index: {}]   ;;  %s1863_s2 = inlined_call_operand.hbm [shape: f32[128,128], index: 2, kind: output, shape index: {0}]   ;;  %s1864_s3 = inlined_call_operand.hbm [shape: f32[1,128], index: 3, kind: output, shape index: {1}]  }
   0x1   :  { %10 = vsyncpa [#allocation6], 0 }
   0x2   :  { %11 = vsyncpa [#allocation4], 0 }
   0x3   :  { %12 = vsyncpa [#allocation9], 0  ;;  %s1528_s12 = smov [#allocation2]   ;;  %s1432_s16 = scalar_lea.hbm %s1861_s0, 8192 }
   0x4   :  { %s18_s13 = sshll.u32 %s1528_s12, 4  ;;  %p1433_p0 = scmp.ne.s32.totalorder %s1861_s0, %s1432_s16  ;;  %s19_s13 = int_to_ptr.vmem [resolvable:$true] %s18_s13 }
   0x5   :  { %p1436_p1 = scmp.lt.u32.totalorder %s1432_s16, %s1861_s0 }
   0x7   :  { %p1438_p2 = pnand %p1436_p1, %p1433_p0 }
   0x9   :  { %1441 = shalt.err (!%p1438_p2)
}
   0xa   :  { %s1442_s21 = scalar_lea.vmem %s19_s13, 8192  ;;  %p1447_p4 = scmp.lt.s32.totalorder %s19_s13, %s19_s13 }
   0xb   :  { %p1443_p3 = scmp.ne.s32.totalorder %s19_s13, %s1442_s21  ;;  %p1448_p5 = scmp.lt.s32.totalorder %s1442_s21, %s1442_s21 }
   0xd   :  { %p1449_p6 = por %p1448_p5, %p1447_p4 }
   0xf   :  { %p1450_p7 = pnand %p1449_p6, %p1443_p3 }
  0x11   :  { %1453 = shalt.err (!%p1450_p7)
}
  0x12   :  { %s1529_s22 = smov 128   ;;  %s1530_s23 = smov 8  }
  0x13   :  { %24 = dma.hbm_to_vmem [thread:$0]  %s1861_s0, 8192, %s19_s13, [#allocation3], %s1529_s22, %s1529_s22, %s1530_s23  }
  0x14   :  { %s1531_s26 = smov [#allocation5]   ;;  %s1454_s30 = scalar_lea.hbm %s1862_s1, 64 }
  0x15   :  { %s31_s27 = sshll.u32 %s1531_s26, 4  ;;  %p1455_p8 = scmp.ne.s32.totalorder %s1862_s1, %s1454_s30  ;;  %s32_s27 = int_to_ptr.vmem [resolvable:$true] %s31_s27 }
  0x16   :  { %p1458_p9 = scmp.lt.u32.totalorder %s1454_s30, %s1862_s1 }
  0x18   :  { %p1460_p10 = pnand %p1458_p9, %p1455_p8 }
  0x1a   :  { %1463 = shalt.err (!%p1460_p10)
}
  0x1b   :  { %s1464_s8 = scalar_lea.vmem %s32_s27, 64  ;;  %p1469_p12 = scmp.lt.s32.totalorder %s32_s27, %s32_s27 }
  0x1c   :  { %p1465_p11 = scmp.ne.s32.totalorder %s32_s27, %s1464_s8  ;;  %p1470_p13 = scmp.lt.s32.totalorder %s1464_s8, %s1464_s8 }
  0x1e   :  { %p1471_p0 = por %p1470_p13, %p1469_p12 }
  0x20   :  { %p1472_p1 = pnand %p1471_p0, %p1465_p11 }
  0x22   :  { %1475 = shalt.err (!%p1472_p1)
}
  0x23   :  { %34 = dma.hbm_to_vmem [thread:$0]  %s1862_s1, 64, %s32_s27, [#allocation6]  }
  0x24   :  { %1520 = dma.done.wait [#allocation3], 8192  }
  0x25   :  { %1521 = vsyncadd [#allocation3], 4294959104 }
  0x26   :  { %1522 = dma.done.wait [#allocation6], 64  }
  0x27   :  { %1523 = vsyncadd [#allocation6], 4294967232  ;;  %v78_v0 = vld [vmem:[#allocation2 + $0x80] sm:$0xff]  ;;  %v79_v5 = vld [vmem:[#allocation2 + $0x88] sm:$0xff]  ;;  %s1533_s1 = smov [#allocation7]  }
  0x28   :  { %v110_v1 = vld [vmem:[#allocation2 + $0x180] sm:$0xff]  ;;  %v111_v6 = vld [vmem:[#allocation2 + $0x188] sm:$0xff]  ;;  %v1582_v10 = vpack.c.bf16 %v79_v5, %v78_v0  ;;  %v80_v13 = vld [vmem:[#allocation2 + $0x90] sm:$0xff]  ;;  %s816_s10 = sshll.u32 %s1533_s1, 4  ;;  %s817_s10 = int_to_ptr.vmem [resolvable:$true] %s816_s10 }
  0x29   :  { %v62_v2 = vld [vmem:[#allocation2] sm:$0xff]  ;;  %v1208_v3 = vpack.i.bf16 %v110_v1, %v78_v0  ;;  %v63_v8 = vld [vmem:[#allocation2 + $0x8] sm:$0xff]  ;;  %v1584_v11 = vpack.c.bf16 %v111_v6, %v110_v1  ;;  %v1210_v12 = vpack.i.bf16 %v111_v6, %v79_v5  ;;  %v112_v17 = vld [vmem:[#allocation2 + $0x190] sm:$0xff]  ;;  %s1476_s11 = scalar_lea.vmem %s817_s10, 2048  ;;  %p1481_p3 = scmp.lt.s32.totalorder %s817_s10, %s817_s10 }
  0x2a   :  { %v94_v4 = vld [vmem:[#allocation2 + $0x100] sm:$0xff]  ;;  %v95_v9 = vld [vmem:[#allocation2 + $0x108] sm:$0xff]  ;;  %v1586_v14 = vpack.c.bf16 %v63_v8, %v62_v2  ;;  %v81_v18 = vld [vmem:[#allocation2 + $0x98] sm:$0xff]  ;;  %1074 = vmatprep.subr.bf16.mxu0 %v1582_v10  ;;  %v1212_v27 = vpack.i.bf16 %v112_v17, %v80_v13  ;;  %p1477_p2 = scmp.ne.s32.totalorder %s817_s10, %s1476_s11  ;;  %p1482_p4 = scmp.lt.s32.totalorder %s1476_s11, %s1476_s11 }
  0x2b   :  { %v1320_v7 = vpack.i.bf16 %v94_v4, %v62_v2  ;;  %1209 = vxpose.xlu0.b32.start [1/16] %v1208_v3, 128  ;;  %v1588_v15 = vpack.c.bf16 %v95_v9, %v94_v4  ;;  %v1322_v16 = vpack.i.bf16 %v95_v9, %v63_v8  ;;  %v113_v19 = vld [vmem:[#allocation2 + $0x198] sm:$0xff]  ;;  %v64_v20 = vld [vmem:[#allocation2 + $0x10] sm:$0xff]  ;;  %v1593_v23 = vpack.c.bf16 %v81_v18, %v80_v13  ;;  %v82_v29 = vld [vmem:[#allocation2 + $0xa0] sm:$0xff] }
  0x2c   :  { %v96_v21 = vld [vmem:[#allocation2 + $0x110] sm:$0xff]  ;;  %v1591_v22 = vpack.c.bf16 %v113_v19, %v112_v17  ;;  %v65_v24 = vld [vmem:[#allocation2 + $0x18] sm:$0xff]  ;;  %1106 = vmatprep.subr.bf16.mxu1 %v1584_v11  ;;  %1076 = vmatpush3.bf16.msra.mxu0 %v1586_v14  ;;  %v1602_v30 = vld [vmem:[#allocation2 + $0xa8] sm:$0xff]  ;;  %v1214_v41 = vpack.i.bf16 %v113_v19, %v81_v18  ;;  %p1483_p5 = por %p1482_p4, %p1481_p3 }
  0x2d   :  { %1321 = vxpose.xlu1.b32.start [1/16] %v1320_v7, 128  ;;  %v97_v25 = vld [vmem:[#allocation2 + $0x118] sm:$0xff]  ;;  %v1596_v26 = vpack.c.bf16 %v65_v24, %v64_v20  ;;  %1108 = vmatpush3.bf16.msra.mxu1 %v1588_v15  ;;  %v1324_v31 = vpack.i.bf16 %v96_v21, %v64_v20  ;;  %v114_v32 = vld [vmem:[#allocation2 + $0x1a0] sm:$0xff]  ;;  %v1605_v33 = vld [vmem:[#allocation2 + $0x1a8] sm:$0xff]  ;;  %v1608_v34 = vpack.c.bf16 %v1602_v30, %v82_v29 }
  0x2e   :  { %v1600_v28 = vpack.c.bf16 %v97_v25, %v96_v21  ;;  %1078 = vmatprep.subr.bf16.mxu0 %v1593_v23  ;;  %v66_v35 = vld [vmem:[#allocation2 + $0x20] sm:$0xff]  ;;  %v1611_v36 = vpack.c.bf16 %v1605_v33, %v114_v32  ;;  %v1613_v37 = vld [vmem:[#allocation2 + $0x28] sm:$0xff]  ;;  %1110 = vmatprep.subr.bf16.mxu1 %v1591_v22  ;;  %v1625_v43 = vld [vmem:[#allocation2 + $0xb0] sm:$0xff]  ;;  %v1326_v44 = vpack.i.bf16 %v97_v25, %v65_v24  ;;  %p1484_p6 = pnand %p1483_p5, %p1477_p2 }
  0x2f   :  { %1211 = vxpose.xlu0.b32.cont [2/16] %v1210_v12, 128  ;;  %v98_v38 = vld [vmem:[#allocation2 + $0x120] sm:$0xff]  ;;  %v1616_v39 = vld [vmem:[#allocation2 + $0x128] sm:$0xff]  ;;  %v1619_v40 = vpack.c.bf16 %v1613_v37, %v66_v35  ;;  %v1628_v45 = vld [vmem:[#allocation2 + $0x1b0] sm:$0xff]  ;;  %v1216_v55 = vpack.i.bf16 %v114_v32, %v82_v29  ;;  %v1218_v5 = vpack.i.bf16 %v1605_v33, %v1602_v30 }
  0x30   :  { %1080 = vmatpush3.bf16.msra.mxu0 %v1596_v26  ;;  %v1623_v42 = vpack.c.bf16 %v1616_v39, %v98_v38  ;;  %v1630_v46 = vld [vmem:[#allocation2 + $0xb8] sm:$0xff]  ;;  %v1635_v48 = vld [vmem:[#allocation2 + $0x30] sm:$0xff]  ;;  %v1661_v57 = vld [vmem:[#allocation2 + $0xc0] sm:$0xff]  ;;  %v1328_v59 = vpack.i.bf16 %v98_v38, %v66_v35  ;;  %v1330_v9 = vpack.i.bf16 %v1616_v39, %v1613_v37  ;;  %v1220_v25 = vpack.i.bf16 %v1628_v45, %v1625_v43 }
  0x31   :  { %1323 = vxpose.xlu1.b32.cont [2/16] %v1322_v16, 128  ;;  %1112 = vmatpush3.bf16.msra.mxu1 %v1600_v28  ;;  %v1632_v47 = vld [vmem:[#allocation2 + $0x1b8] sm:$0xff]  ;;  %v1643_v50 = vpack.c.bf16 %v1630_v46, %v1625_v43  ;;  %v1648_v52 = vld [vmem:[#allocation2 + $0x130] sm:$0xff]  ;;  %v1663_v58 = vld [vmem:[#allocation2 + $0xc8] sm:$0xff] }
  0x32   :  { %1082 = vmatprep.subr.bf16.mxu0 %v1608_v34  ;;  %v1639_v49 = vpack.c.bf16 %v1632_v47, %v1628_v45  ;;  %v1645_v51 = vld [vmem:[#allocation2 + $0x38] sm:$0xff]  ;;  %1114 = vmatprep.subr.bf16.mxu1 %v1611_v36  ;;  %v1666_v60 = vld [vmem:[#allocation2 + $0x1c0] sm:$0xff]  ;;  %v1668_v61 = vld [vmem:[#allocation2 + $0x1c8] sm:$0xff]  ;;  %v1672_v62 = vpack.c.bf16 %v1663_v58, %v1661_v57  ;;  %v1222_v45 = vpack.i.bf16 %v1632_v47, %v1630_v46 }
  0x33   :  { %1213 = vxpose.xlu0.b32.cont [3/16] %v1212_v27, 128  ;;  %v1650_v53 = vld [vmem:[#allocation2 + $0x138] sm:$0xff]  ;;  %v1654_v54 = vpack.c.bf16 %v1645_v51, %v1635_v48  ;;  %v1674_v63 = vld [vmem:[#allocation2 + $0x40] sm:$0xff]  ;;  %v1678_v0 = vpack.c.bf16 %v1668_v61, %v1666_v60  ;;  %v1680_v1 = vld [vmem:[#allocation2 + $0x48] sm:$0xff] }
  0x34   :  { %1084 = vmatpush3.bf16.msra.mxu0 %v1619_v40  ;;  %v1659_v56 = vpack.c.bf16 %v1650_v53, %v1648_v52  ;;  %v1684_v2 = vld [vmem:[#allocation2 + $0x140] sm:$0xff]  ;;  %v1686_v3 = vld [vmem:[#allocation2 + $0x148] sm:$0xff]  ;;  %v1690_v4 = vpack.c.bf16 %v1680_v1, %v1674_v63  ;;  %v1699_v7 = vld [vmem:[#allocation2 + $0xd0] sm:$0xff] }
  0x35   :  { %1325 = vxpose.xlu1.b32.cont [3/16] %v1324_v31, 128  ;;  %1116 = vmatpush3.bf16.msra.mxu1 %v1623_v42  ;;  %v1697_v6 = vpack.c.bf16 %v1686_v3, %v1684_v2  ;;  %v1701_v8 = vld [vmem:[#allocation2 + $0xd8] sm:$0xff]  ;;  %v1706_v12 = vld [vmem:[#allocation2 + $0x1d0] sm:$0xff]  ;;  %v1739_v29 = vld [vmem:[#allocation2 + $0xe0] sm:$0xff]  ;;  %v1332_v31 = vpack.i.bf16 %v1648_v52, %v1635_v48 }
  0x36   :  { %1086 = vmatprep.subr.bf16.mxu0 %v1643_v50  ;;  %1118 = vmatprep.subr.bf16.mxu1 %v1639_v49  ;;  %v1708_v13 = vld [vmem:[#allocation2 + $0x1d8] sm:$0xff]  ;;  %v1712_v16 = vpack.c.bf16 %v1701_v8, %v1699_v7  ;;  %v1715_v17 = vld [vmem:[#allocation2 + $0x50] sm:$0xff]  ;;  %v1741_v30 = vld [vmem:[#allocation2 + $0xe8] sm:$0xff] }
  0x37   :  { %1215 = vxpose.xlu0.b32.cont [4/16] %v1214_v41, 128  ;;  %1869 = vst [vmem:[#allocation14_spill] sm:$0xff] %v1697_v6  ;;  %v1719_v18 = vpack.c.bf16 %v1708_v13, %v1706_v12  ;;  %v1721_v19 = vld [vmem:[#allocation2 + $0x58] sm:$0xff]  ;;  %v1724_v20 = vld [vmem:[#allocation2 + $0x150] sm:$0xff]  ;;  %v122_v32 = vld [vmem:[#allocation2 + $0x1e0] sm:$0xff]  ;;  %v1750_v35 = vpack.c.bf16 %v1741_v30, %v1739_v29 }
  0x38   :  { %1088 = vmatpush3.bf16.msra.mxu0 %v1654_v54  ;;  %1870 = vst [vmem:[#allocation15_spill] sm:$0xff] %v1712_v16  ;;  %v1726_v21 = vld [vmem:[#allocation2 + $0x158] sm:$0xff]  ;;  %v1730_v24 = vpack.c.bf16 %v1721_v19, %v1715_v17  ;;  %v1746_v33 = vld [vmem:[#allocation2 + $0x1e8] sm:$0xff]  ;;  %v74_v37 = vld [vmem:[#allocation2 + $0x60] sm:$0xff] }
  0x39   :  { %1327 = vxpose.xlu1.b32.cont [4/16] %v1326_v44, 128  ;;  %1120 = vmatpush3.bf16.msra.mxu1 %v1659_v56  ;;  %1871 = vst [vmem:[#allocation16_spill] sm:$0xff] %v1719_v18  ;;  %v1737_v27 = vpack.c.bf16 %v1726_v21, %v1724_v20  ;;  %v1754_v38 = vpack.c.bf16 %v1746_v33, %v122_v32  ;;  %v75_v39 = vld [vmem:[#allocation2 + $0x68] sm:$0xff]  ;;  %v106_v41 = vld [vmem:[#allocation2 + $0x160] sm:$0xff]  ;;  %v92_v52 = vld [vmem:[#allocation2 + $0xf0] sm:$0xff] }
  0x3a   :  { %1090 = vmatprep.subr.bf16.mxu0 %v1672_v62  ;;  %1122 = vmatprep.subr.bf16.mxu1 %v1678_v0  ;;  %1872 = vst [vmem:[#allocation17_spill] sm:$0xff] %v1730_v24  ;;  %v107_v43 = vld [vmem:[#allocation2 + $0x168] sm:$0xff]  ;;  %v1757_v44 = vpack.c.bf16 %v75_v39, %v74_v37  ;;  %v77_v46 = vld [vmem:[#allocation2 + $0x78] sm:$0xff]  ;;  %v108_v47 = vld [vmem:[#allocation2 + $0x170] sm:$0xff] }
  0x3b   :  { %1217 = vxpose.xlu0.b32.cont [5/16] %v1216_v55, 128  ;;  %v1762_v48 = vpack.c.bf16 %v107_v43, %v106_v41  ;;  %v93_v55 = vld [vmem:[#allocation2 + $0xf8] sm:$0xff] }
  0x3c   :  { %1092 = vmatpush3.bf16.msra.mxu0 %v1690_v4 }
  0x3d   :  { %1329 = vxpose.xlu1.b32.cont [5/16] %v1328_v59, 128  ;;  %1124 = vmatpush3.bf16.msra.mxu1 %v1697_v6  ;;  %v1334_v59 = vpack.i.bf16 %v1650_v53, %v1645_v51  ;;  %v1224_v51 = vpack.i.bf16 %v1666_v60, %v1661_v57  ;;  %v1338_v57 = vpack.i.bf16 %v1686_v3, %v1680_v1 }
  0x3e   :  { %1094 = vmatprep.subr.bf16.mxu0 %v1712_v16  ;;  %1126 = vmatprep.subr.bf16.mxu1 %v1719_v18  ;;  %v1767_v18 = vpack.c.bf16 %v93_v55, %v92_v52  ;;  %v109_v16 = vld [vmem:[#allocation2 + $0x178] sm:$0xff]  ;;  %v1228_v60 = vpack.i.bf16 %v1706_v12, %v1699_v7  ;;  %v1234_v1 = vpack.i.bf16 %v1746_v33, %v1741_v30 }
  0x3f   :  { %1219 = vxpose.xlu0.b32.cont [6/16] %v1218_v5, 128  ;;  %v124_v5 = vld [vmem:[#allocation2 + $0x1f0] sm:$0xff]  ;;  %v1778_v53 = vpack.c.bf16 %v109_v16, %v108_v47  ;;  %v1350_v12 = vpack.i.bf16 %v109_v16, %v77_v46 }
  0x40   :  { %1096 = vmatpush3.bf16.msra.mxu0 %v1730_v24  ;;  %v1236_v3 = vpack.i.bf16 %v124_v5, %v92_v52 }
  0x41   :  { %1331 = vxpose.xlu1.b32.cont [6/16] %v1330_v9, 128  ;;  %1128 = vmatpush3.bf16.msra.mxu1 %v1737_v27  ;;  %v125_v9 = vld [vmem:[#allocation2 + $0x1f8] sm:$0xff] }
  0x42   :  { %1098 = vmatprep.subr.bf16.mxu0 %v1750_v35  ;;  %v1770_v24 = vpack.c.bf16 %v125_v9, %v124_v5  ;;  %1130 = vmatprep.subr.bf16.mxu1 %v1754_v38 }
  0x43   :  { %1221 = vxpose.xlu0.b32.cont [7/16] %v1220_v25, 128  ;;  %v76_v25 = vld [vmem:[#allocation2 + $0x70] sm:$0xff] }
  0x44   :  { %v1773_v6 = vpack.c.bf16 %v77_v46, %v76_v25  ;;  %1100 = vmatpush3.bf16.msra.mxu0 %v1757_v44  ;;  %v1348_v7 = vpack.i.bf16 %v108_v47, %v76_v25 }
  0x45   :  { %1333 = vxpose.xlu1.b32.cont [7/16] %v1332_v31, 128  ;;  %1132 = vmatpush3.bf16.msra.mxu1 %v1762_v48  ;;  %v1336_v31 = vpack.i.bf16 %v1684_v2, %v1674_v63  ;;  %v1340_v63 = vpack.i.bf16 %v1724_v20, %v1715_v17  ;;  %v1346_v2 = vpack.i.bf16 %v107_v43, %v75_v39 }
  0x46   :  { %1102 = vmatprep.subr.bf16.mxu0 %v1767_v18  ;;  %1134 = vmatprep.subr.bf16.mxu1 %v1770_v24 }
  0x47   :  { %1223 = vxpose.xlu0.b32.cont [8/16] %v1222_v45, 128  ;;  %v1226_v45 = vpack.i.bf16 %v1668_v61, %v1663_v58  ;;  %v1230_v58 = vpack.i.bf16 %v1708_v13, %v1701_v8  ;;  %v1342_v61 = vpack.i.bf16 %v1726_v21, %v1721_v19  ;;  %v1238_v8 = vpack.i.bf16 %v125_v9, %v93_v55 }
  0x48   :  { %1104 = vmatpush3.bf16.msra.mxu0 %v1773_v6 }
  0x49   :  { %1335 = vxpose.xlu1.b32.cont [8/16] %v1334_v59, 128  ;;  %1136 = vmatpush3.bf16.msra.mxu1 %v1778_v53 }
  0x4a   :  { %1138 = vmatprep.subr.bf16.mxu0 %v1582_v10  ;;  %1170 = vmatprep.subr.bf16.mxu1 %v1584_v11  ;;  %v1232_v10 = vpack.i.bf16 %v122_v32, %v1739_v29  ;;  %v1344_v11 = vpack.i.bf16 %v106_v41, %v74_v37 }
  0x4b   :  { %1225 = vxpose.xlu0.b32.cont [9/16] %v1224_v51, 128  ;;  %v1873_v51 = vld [vmem:[#allocation14_spill] sm:$0xff] }
  0x4d   :  { %1337 = vxpose.xlu1.b32.cont [9/16] %v1336_v31, 128  ;;  %v1874_v31 = vld [vmem:[#allocation15_spill] sm:$0xff] }
  0x4f   :  { %1227 = vxpose.xlu0.b32.cont [10/16] %v1226_v45, 128  ;;  %v1875_v45 = vld [vmem:[#allocation16_spill] sm:$0xff] }
  0x51   :  { %1339 = vxpose.xlu1.b32.cont [10/16] %v1338_v57, 128 }
  0x53   :  { %1229 = vxpose.xlu0.b32.cont [11/16] %v1228_v60, 128 }
  0x55   :  { %1341 = vxpose.xlu1.b32.cont [11/16] %v1340_v63, 128  ;;  %v1876_v63 = vld [vmem:[#allocation17_spill] sm:$0xff] }
  0x57   :  { %1231 = vxpose.xlu0.b32.cont [12/16] %v1230_v58, 128 }
  0x59   :  { %1343 = vxpose.xlu1.b32.cont [12/16] %v1342_v61, 128 }
  0x5b   :  { %1233 = vxpose.xlu0.b32.cont [13/16] %v1232_v10, 128 }
  0x5d   :  { %1345 = vxpose.xlu1.b32.cont [13/16] %v1344_v11, 128 }
  0x5f   :  { %1235 = vxpose.xlu0.b32.cont [14/16] %v1234_v1, 128 }
  0x61   :  { %1347 = vxpose.xlu1.b32.cont [14/16] %v1346_v2, 128 }
  0x63   :  { %1237 = vxpose.xlu0.b32.cont [15/16] %v1236_v3, 128 }
  0x65   :  { %1349 = vxpose.xlu1.b32.cont [15/16] %v1348_v7, 128 }
  0x67   :  { %1239 = vxpose.xlu0.b32.end [16/16] %v1238_v8, 128 }
  0x69   :  { %1351 = vxpose.xlu1.b32.end [16/16] %v1350_v12, 128 }
  0xab   :  { %v1240_v13 = vpop.trf.xlu0 }
  0xac   :  { %v1241_v19 = vunpack.i.l.bf16 %v1240_v13  ;;  %v1244_v20 = vunpack.i.h.bf16 %v1240_v13 }
  0xad   :  { %v1352_v17 = vpop.trf.xlu1 }
  0xae   :  { %v1353_v21 = vunpack.i.l.bf16 %v1352_v17  ;;  %v1356_v29 = vunpack.i.h.bf16 %v1352_v17  ;;  %335 = vmatprep.mubr.f32.mxu0 %v1241_v19  ;;  %480 = vmatprep.mubr.f32.mxu1 %v1244_v20 }
  0xaf   :  { %v1245_v30 = vpop.trf.xlu0 }
  0xb0   :  { %336 = vmatmul.mubr.f32.vlgmr.msra.gmra.mrb[0].mxu0 %v1353_v21  ;;  %481 = vmatmul.mubr.f32.vlgmr.msra.gmra.mrb[0].mxu1 %v1356_v29  ;;  %v1246_v33 = vunpack.i.l.bf16 %v1245_v30  ;;  %v1249_v16 = vunpack.i.h.bf16 %v1245_v30 }
  0xb1   :  { %1140 = vmatpush3.bf16.msra.mxu0 %v1586_v14  ;;  %1172 = vmatpush3.bf16.msra.mxu1 %v1588_v15  ;;  %v1357_v32 = vpop.trf.xlu1 }
  0xb2   :  { %v1358_v37 = vunpack.i.l.bf16 %v1357_v32  ;;  %v1361_v39 = vunpack.i.h.bf16 %v1357_v32  ;;  %1142 = vmatprep.subr.bf16.mxu0 %v1593_v23  ;;  %1174 = vmatprep.subr.bf16.mxu1 %v1591_v22 }
  0xb3   :  { %340 = vmatprep.mubr.f32.mxu0 %v1246_v33  ;;  %485 = vmatprep.mubr.f32.mxu1 %v1249_v16  ;;  %v1250_v41 = vpop.trf.xlu0 }
  0xb4   :  { %341 = vmatmul.mubr.f32.gmra.mrb[2].mxu0 %v1358_v37  ;;  %486 = vmatmul.mubr.f32.gmra.mrb[2].mxu1 %v1361_v39  ;;  %v1251_v52 = vunpack.i.l.bf16 %v1250_v41  ;;  %v1254_v55 = vunpack.i.h.bf16 %v1250_v41 }
  0xb5   :  { %v1362_v43 = vpop.trf.xlu1  ;;  %1144 = vmatpush3.bf16.msra.mxu0 %v1596_v26  ;;  %1176 = vmatpush3.bf16.msra.mxu1 %v1600_v28 }
  0xb6   :  { %v1363_v14 = vunpack.i.l.bf16 %v1362_v43  ;;  %v1366_v15 = vunpack.i.h.bf16 %v1362_v43  ;;  %1146 = vmatprep.subr.bf16.mxu0 %v1608_v34  ;;  %1178 = vmatprep.subr.bf16.mxu1 %v1611_v36  ;;  %v595_v43 = vlaneseq }
  0xb7   :  { %345 = vmatprep.mubr.f32.mxu0 %v1251_v52  ;;  %490 = vmatprep.mubr.f32.mxu1 %v1254_v55  ;;  %v1255_v22 = vpop.trf.xlu0 }
  0xb8   :  { %346 = vmatmul.mubr.f32.gmra.mrb[4].mxu0 %v1363_v14  ;;  %491 = vmatmul.mubr.f32.gmra.mrb[4].mxu1 %v1366_v15  ;;  %v1256_v59 = vunpack.i.l.bf16 %v1255_v22  ;;  %v1259_v5 = vunpack.i.h.bf16 %v1255_v22 }
  0xb9   :  { %v1367_v23 = vpop.trf.xlu1  ;;  %1148 = vmatpush3.bf16.msra.mxu0 %v1619_v40  ;;  %1180 = vmatpush3.bf16.msra.mxu1 %v1623_v42 }
  0xba   :  { %v1368_v26 = vunpack.i.l.bf16 %v1367_v23  ;;  %v1371_v28 = vunpack.i.h.bf16 %v1367_v23  ;;  %1150 = vmatprep.subr.bf16.mxu0 %v1643_v50  ;;  %1182 = vmatprep.subr.bf16.mxu1 %v1639_v49 }
  0xbb   :  { %350 = vmatprep.mubr.f32.mxu0 %v1256_v59  ;;  %495 = vmatprep.mubr.f32.mxu1 %v1259_v5  ;;  %v1260_v34 = vpop.trf.xlu0  ;;  %v596_v59 = vshrl.u32 %v595_v43, 7 }
  0xbc   :  { %351 = vmatmul.mubr.f32.gmra.mrb[6].mxu0 %v1368_v26  ;;  %496 = vmatmul.mubr.f32.gmra.mrb[6].mxu1 %v1371_v28  ;;  %v1261_v9 = vunpack.i.l.bf16 %v1260_v34  ;;  %v1264_v25 = vunpack.i.h.bf16 %v1260_v34 }
  0xbd   :  { %v1372_v36 = vpop.trf.xlu1  ;;  %1152 = vmatpush3.bf16.msra.mxu0 %v1654_v54  ;;  %1184 = vmatpush3.bf16.msra.mxu1 %v1659_v56 }
  0xbe   :  { %v1373_v40 = vunpack.i.l.bf16 %v1372_v36  ;;  %v1376_v42 = vunpack.i.h.bf16 %v1372_v36  ;;  %1154 = vmatprep.subr.bf16.mxu0 %v1672_v62  ;;  %1186 = vmatprep.subr.bf16.mxu1 %v1678_v0 }
  0xbf   :  { %355 = vmatprep.mubr.f32.mxu0 %v1261_v9  ;;  %500 = vmatprep.mubr.f32.mxu1 %v1264_v25  ;;  %v1265_v49 = vpop.trf.xlu0  ;;  %v601_v25 = vsub.s32 1, %v596_v59 }
  0xc0   :  { %356 = vmatmul.mubr.f32.gmra.mrb[8].mxu0 %v1373_v40  ;;  %501 = vmatmul.mubr.f32.gmra.mrb[8].mxu1 %v1376_v42  ;;  %v1266_v46 = vunpack.i.l.bf16 %v1265_v49  ;;  %v1269_v47 = vunpack.i.h.bf16 %v1265_v49  ;;  %v609_v40 = vsub.s32 3, %v596_v59 }
  0xc1   :  { %v1377_v50 = vpop.trf.xlu1  ;;  %1156 = vmatpush3.bf16.msra.mxu0 %v1690_v4  ;;  %1188 = vmatpush3.bf16.msra.mxu1 %v1873_v51 }
  0xc2   :  { %v1378_v54 = vunpack.i.l.bf16 %v1377_v50  ;;  %v1381_v56 = vunpack.i.h.bf16 %v1377_v50  ;;  %1158 = vmatprep.subr.bf16.mxu0 %v1874_v31  ;;  %1190 = vmatprep.subr.bf16.mxu1 %v1875_v45  ;;  %v597_v45 = vsub.s32 0, %v596_v59 }
  0xc3   :  { %360 = vmatprep.mubr.f32.mxu0 %v1266_v46  ;;  %505 = vmatprep.mubr.f32.mxu1 %v1269_v47  ;;  %v1270_v62 = vpop.trf.xlu0  ;;  %v126_v46 = vld [vmem:[#allocation5] sm:$0xf] }
  0xc4   :  { %361 = vmatmul.mubr.f32.gmra.mrb[10].mxu0 %v1378_v54  ;;  %506 = vmatmul.mubr.f32.gmra.mrb[10].mxu1 %v1381_v56  ;;  %v1271_v57 = vunpack.i.l.bf16 %v1270_v62  ;;  %v1274_v60 = vunpack.i.h.bf16 %v1270_v62  ;;  %v602_v56 = vrot.slane %v126_v46, %v601_v25  ;;  %v610_v31 = vrot.slane %v126_v46, %v609_v40 }
  0xc5   :  { %v1382_v0 = vpop.trf.xlu1  ;;  %1160 = vmatpush3.bf16.msra.mxu0 %v1876_v63  ;;  %1192 = vmatpush3.bf16.msra.mxu1 %v1737_v27  ;;  %v605_v62 = vsub.s32 2, %v596_v59 }
  0xc6   :  { %v1383_v4 = vunpack.i.l.bf16 %v1382_v0  ;;  %v1386_v58 = vunpack.i.h.bf16 %v1382_v0  ;;  %1162 = vmatprep.subr.bf16.mxu0 %v1750_v35  ;;  %1194 = vmatprep.subr.bf16.mxu1 %v1754_v38 }
  0xc7   :  { %365 = vmatprep.mubr.f32.mxu0 %v1271_v57  ;;  %510 = vmatprep.mubr.f32.mxu1 %v1274_v60  ;;  %v1275_v61 = vpop.trf.xlu0 }
  0xc8   :  { %366 = vmatmul.mubr.f32.gmra.mrb[12].mxu0 %v1383_v4  ;;  %511 = vmatmul.mubr.f32.gmra.mrb[12].mxu1 %v1386_v58  ;;  %v1276_v11 = vunpack.i.l.bf16 %v1275_v61  ;;  %v1279_v1 = vunpack.i.h.bf16 %v1275_v61  ;;  %v598_v58 = vrot.slane %v126_v46, %v597_v45  ;;  %v606_v61 = vrot.slane %v126_v46, %v605_v62 }
  0xc9   :  { %v1387_v10 = vpop.trf.xlu1  ;;  %1164 = vmatpush3.bf16.msra.mxu0 %v1757_v44  ;;  %1196 = vmatpush3.bf16.msra.mxu1 %v1762_v48 }
  0xca   :  { %v1388_v2 = vunpack.i.l.bf16 %v1387_v10  ;;  %v1391_v27 = vunpack.i.h.bf16 %v1387_v10  ;;  %1166 = vmatprep.subr.bf16.mxu0 %v1767_v18  ;;  %1198 = vmatprep.subr.bf16.mxu1 %v1770_v24  ;;  %v1532_v10 = vmov 0.0  }
  0xcb   :  { %370 = vmatprep.mubr.f32.mxu0 %v1276_v11  ;;  %515 = vmatprep.mubr.f32.mxu1 %v1279_v1  ;;  %v1280_v35 = vpop.trf.xlu0  ;;  %61 = vst [vmem:[#allocation8] sm:$0x1] %v1532_v10 }
  0xcc   :  { %371 = vmatmul.mubr.f32.gmra.mrb[14].mxu0 %v1388_v2  ;;  %516 = vmatmul.mubr.f32.gmra.mrb[14].mxu1 %v1391_v27  ;;  %v1281_v3 = vunpack.i.l.bf16 %v1280_v35  ;;  %v1284_v7 = vunpack.i.h.bf16 %v1280_v35 }
  0xcd   :  { %v1392_v38 = vpop.trf.xlu1  ;;  %1168 = vmatpush3.bf16.msra.mxu0 %v1773_v6  ;;  %1200 = vmatpush3.bf16.msra.mxu1 %v1778_v53 }
  0xce   :  { %v1393_v44 = vunpack.i.l.bf16 %v1392_v38  ;;  %v1396_v48 = vunpack.i.h.bf16 %v1392_v38  ;;  %375 = vmatprep.mubr.f32.mxu0 %v1281_v3  ;;  %520 = vmatprep.mubr.f32.mxu1 %v1284_v7 }
  0xcf   :  { %v1285_v8 = vpop.trf.xlu0 }
  0xd0   :  { %376 = vmatmul.mubr.f32.gmra.mrb[16].mxu0 %v1393_v44  ;;  %521 = vmatmul.mubr.f32.gmra.mrb[16].mxu1 %v1396_v48  ;;  %v1286_v24 = vunpack.i.l.bf16 %v1285_v8  ;;  %v1289_v12 = vunpack.i.h.bf16 %v1285_v8 }
  0xd1   :  { %v1397_v18 = vpop.trf.xlu1 }
  0xd2   :  { %v1398_v13 = vunpack.i.l.bf16 %v1397_v18  ;;  %v1401_v17 = vunpack.i.h.bf16 %v1397_v18  ;;  %380 = vmatprep.mubr.f32.mxu0 %v1286_v24  ;;  %525 = vmatprep.mubr.f32.mxu1 %v1289_v12 }
  0xd3   :  { %v1290_v19 = vpop.trf.xlu0 }
  0xd4   :  { %381 = vmatmul.mubr.f32.gmra.mrb[18].mxu0 %v1398_v13  ;;  %526 = vmatmul.mubr.f32.gmra.mrb[18].mxu1 %v1401_v17  ;;  %v1291_v20 = vunpack.i.l.bf16 %v1290_v19  ;;  %v1294_v53 = vunpack.i.h.bf16 %v1290_v19 }
  0xd5   :  { %v1402_v6 = vpop.trf.xlu1 }
  0xd6   :  { %v1403_v21 = vunpack.i.l.bf16 %v1402_v6  ;;  %v1406_v29 = vunpack.i.h.bf16 %v1402_v6  ;;  %385 = vmatprep.mubr.f32.mxu0 %v1291_v20  ;;  %530 = vmatprep.mubr.f32.mxu1 %v1294_v53 }
  0xd7   :  { %v1295_v30 = vpop.trf.xlu0 }
  0xd8   :  { %386 = vmatmul.mubr.f32.gmra.mrb[20].mxu0 %v1403_v21  ;;  %531 = vmatmul.mubr.f32.gmra.mrb[20].mxu1 %v1406_v29  ;;  %v1296_v33 = vunpack.i.l.bf16 %v1295_v30  ;;  %v1299_v16 = vunpack.i.h.bf16 %v1295_v30 }
  0xd9   :  { %v1407_v32 = vpop.trf.xlu1 }
  0xda   :  { %v1408_v37 = vunpack.i.l.bf16 %v1407_v32  ;;  %v1411_v39 = vunpack.i.h.bf16 %v1407_v32  ;;  %390 = vmatprep.mubr.f32.mxu0 %v1296_v33  ;;  %535 = vmatprep.mubr.f32.mxu1 %v1299_v16 }
  0xdb   :  { %v1300_v41 = vpop.trf.xlu0 }
  0xdc   :  { %391 = vmatmul.mubr.f32.gmra.mrb[22].mxu0 %v1408_v37  ;;  %536 = vmatmul.mubr.f32.gmra.mrb[22].mxu1 %v1411_v39  ;;  %v1301_v55 = vunpack.i.l.bf16 %v1300_v41  ;;  %v1304_v14 = vunpack.i.h.bf16 %v1300_v41 }
  0xdd   :  { %v1412_v52 = vpop.trf.xlu1 }
  0xde   :  { %v1413_v15 = vunpack.i.l.bf16 %v1412_v52  ;;  %v1416_v22 = vunpack.i.h.bf16 %v1412_v52  ;;  %395 = vmatprep.mubr.f32.mxu0 %v1301_v55  ;;  %540 = vmatprep.mubr.f32.mxu1 %v1304_v14 }
  0xdf   :  { %v1305_v23 = vpop.trf.xlu0 }
  0xe0   :  { %396 = vmatmul.mubr.f32.gmra.mrb[24].mxu0 %v1413_v15  ;;  %541 = vmatmul.mubr.f32.gmra.mrb[24].mxu1 %v1416_v22  ;;  %v1306_v26 = vunpack.i.l.bf16 %v1305_v23  ;;  %v1309_v28 = vunpack.i.h.bf16 %v1305_v23 }
  0xe1   :  { %v1417_v5 = vpop.trf.xlu1 }
  0xe2   :  { %v1418_v34 = vunpack.i.l.bf16 %v1417_v5  ;;  %v1421_v36 = vunpack.i.h.bf16 %v1417_v5  ;;  %400 = vmatprep.mubr.f32.mxu0 %v1306_v26  ;;  %545 = vmatprep.mubr.f32.mxu1 %v1309_v28 }
  0xe3   :  { %v1310_v9 = vpop.trf.xlu0 }
  0xe4   :  { %401 = vmatmul.mubr.f32.gmra.mrb[26].mxu0 %v1418_v34  ;;  %546 = vmatmul.mubr.f32.gmra.mrb[26].mxu1 %v1421_v36  ;;  %v1311_v49 = vunpack.i.l.bf16 %v1310_v9  ;;  %v1314_v50 = vunpack.i.h.bf16 %v1310_v9 }
  0xe5   :  { %v1422_v42 = vpop.trf.xlu1 }
  0xe6   :  { %v1423_v47 = vunpack.i.l.bf16 %v1422_v42  ;;  %v1426_v51 = vunpack.i.h.bf16 %v1422_v42  ;;  %405 = vmatprep.mubr.f32.mxu0 %v1311_v49  ;;  %550 = vmatprep.mubr.f32.mxu1 %v1314_v50 }
  0xe7   :  { %v1315_v54 = vpop.trf.xlu0 }
  0xe8   :  { %406 = vmatmul.mubr.f32.gmra.mrb[28].mxu0 %v1423_v47  ;;  %551 = vmatmul.mubr.f32.gmra.mrb[28].mxu1 %v1426_v51  ;;  %v1319_v0 = vunpack.i.h.bf16 %v1315_v54  ;;  %v1316_v57 = vunpack.i.l.bf16 %v1315_v54 }
  0xe9   :  { %v1427_v60 = vpop.trf.xlu1 }
  0xea   :  { %v1431_v63 = vunpack.i.h.bf16 %v1427_v60  ;;  %v1428_v4 = vunpack.i.l.bf16 %v1427_v60  ;;  %410 = vmatprep.mubr.f32.mxu0 %v1316_v57  ;;  %555 = vmatprep.mubr.f32.mxu1 %v1319_v0 }
  0xec   :  { %411 = vmatmul.mubr.f32.gmra.mrb[30].mxu0 %v1428_v4  ;;  %556 = vmatmul.mubr.f32.gmra.mrb[30].mxu1 %v1431_v63 }
  0xed   :  { %679 = vmatprep.mubr.f32.mxu0 %v602_v56  ;;  %749 = vmatprep.mubr.f32.mxu1 %v610_v31 }
  0xf0   :  { %680 = vmatmul.mubr.f32.vlgmr.msra.gmra.mrb[32].mxu0 %v598_v58  ;;  %750 = vmatmul.mubr.f32.vlgmr.msra.gmra.mrb[32].mxu1 %v606_v61 }
 0x183   :  { %v875_v11 = vpop.f32.mrb[0].mxu0  ;;  %v955_v1 = vpop.f32.mrb[0].mxu1 }
 0x184   :  { %v876_v2 = vpop.f32.mrb[1].mxu0  ;;  %v956_v27 = vpop.f32.mrb[1].mxu1 }
 0x185   :  { %v877_v35 = vadd.f32 %v876_v2, %v875_v11  ;;  %v957_v38 = vadd.f32 %v956_v27, %v955_v1 }
 0x187   :  { %v483_v3 = vadd.f32 %v957_v38, %v877_v35  ;;  %v878_v7 = vpop.f32.mrb[2].mxu0  ;;  %v958_v44 = vpop.f32.mrb[2].mxu1 }
 0x188   :  { %v879_v48 = vpop.f32.mrb[3].mxu0  ;;  %v959_v8 = vpop.f32.mrb[3].mxu1 }
 0x189   :  { %v880_v18 = vadd.f32 %v879_v48, %v878_v7  ;;  %v960_v24 = vadd.f32 %v959_v8, %v958_v44  ;;  %v776_v12 = vmul.f32 0.001953125, %v483_v3 }
 0x18b   :  { %v488_v13 = vadd.f32 %v960_v24, %v880_v18  ;;  %v881_v17 = vpop.f32.mrb[4].mxu0  ;;  %v961_v19 = vpop.f32.mrb[4].mxu1  ;;  %792 = vst [vmem:[#allocation7] sm:$0xff] %v776_v12 }
 0x18c   :  { %v882_v6 = vpop.f32.mrb[5].mxu0  ;;  %v962_v20 = vpop.f32.mrb[5].mxu1 }
 0x18d   :  { %v883_v53 = vadd.f32 %v882_v6, %v881_v17  ;;  %v963_v21 = vadd.f32 %v962_v20, %v961_v19  ;;  %v777_v29 = vmul.f32 0.001953125, %v488_v13 }
 0x18f   :  { %v493_v30 = vadd.f32 %v963_v21, %v883_v53  ;;  %v884_v32 = vpop.f32.mrb[6].mxu0  ;;  %v964_v33 = vpop.f32.mrb[6].mxu1  ;;  %793 = vst [vmem:[#allocation7 + $0x8] sm:$0xff] %v777_v29 }
 0x190   :  { %v885_v16 = vpop.f32.mrb[7].mxu0  ;;  %v965_v37 = vpop.f32.mrb[7].mxu1 }
 0x191   :  { %v886_v39 = vadd.f32 %v885_v16, %v884_v32  ;;  %v966_v41 = vadd.f32 %v965_v37, %v964_v33  ;;  %v778_v43 = vmul.f32 0.001953125, %v493_v30 }
 0x193   :  { %v498_v52 = vadd.f32 %v966_v41, %v886_v39  ;;  %v887_v55 = vpop.f32.mrb[8].mxu0  ;;  %v967_v14 = vpop.f32.mrb[8].mxu1  ;;  %794 = vst [vmem:[#allocation7 + $0x10] sm:$0xff] %v778_v43 }
 0x194   :  { %v888_v15 = vpop.f32.mrb[9].mxu0  ;;  %v968_v22 = vpop.f32.mrb[9].mxu1 }
 0x195   :  { %v889_v23 = vadd.f32 %v888_v15, %v887_v55  ;;  %v969_v59 = vadd.f32 %v968_v22, %v967_v14  ;;  %v779_v5 = vmul.f32 0.001953125, %v498_v52 }
 0x197   :  { %v503_v26 = vadd.f32 %v969_v59, %v889_v23  ;;  %v890_v28 = vpop.f32.mrb[10].mxu0  ;;  %v970_v34 = vpop.f32.mrb[10].mxu1  ;;  %795 = vst [vmem:[#allocation7 + $0x18] sm:$0xff] %v779_v5 }
 0x198   :  { %v891_v36 = vpop.f32.mrb[11].mxu0  ;;  %v971_v9 = vpop.f32.mrb[11].mxu1 }
 0x199   :  { %v892_v25 = vadd.f32 %v891_v36, %v890_v28  ;;  %v972_v40 = vadd.f32 %v971_v9, %v970_v34  ;;  %v780_v42 = vmul.f32 0.001953125, %v503_v26 }
 0x19b   :  { %v508_v49 = vadd.f32 %v972_v40, %v892_v25  ;;  %v893_v50 = vpop.f32.mrb[12].mxu0  ;;  %v973_v46 = vpop.f32.mrb[12].mxu1  ;;  %796 = vst [vmem:[#allocation7 + $0x20] sm:$0xff] %v780_v42 }
 0x19c   :  { %v894_v47 = vpop.f32.mrb[13].mxu0  ;;  %v974_v51 = vpop.f32.mrb[13].mxu1 }
 0x19d   :  { %v895_v54 = vadd.f32 %v894_v47, %v893_v50  ;;  %v975_v56 = vadd.f32 %v974_v51, %v973_v46  ;;  %v781_v31 = vmul.f32 0.001953125, %v508_v49 }
 0x19f   :  { %v513_v45 = vadd.f32 %v975_v56, %v895_v54  ;;  %v896_v62 = vpop.f32.mrb[14].mxu0  ;;  %v976_v0 = vpop.f32.mrb[14].mxu1  ;;  %797 = vst [vmem:[#allocation7 + $0x28] sm:$0xff] %v781_v31 }
 0x1a0   :  { %v897_v57 = vpop.f32.mrb[15].mxu0  ;;  %v977_v60 = vpop.f32.mrb[15].mxu1 }
 0x1a1   :  { %v898_v63 = vadd.f32 %v897_v57, %v896_v62  ;;  %v978_v4 = vadd.f32 %v977_v60, %v976_v0  ;;  %v782_v58 = vmul.f32 0.001953125, %v513_v45 }
 0x1a3   :  { %v518_v61 = vadd.f32 %v978_v4, %v898_v63  ;;  %v899_v10 = vpop.f32.mrb[16].mxu0  ;;  %v979_v11 = vpop.f32.mrb[16].mxu1  ;;  %798 = vst [vmem:[#allocation7 + $0x30] sm:$0xff] %v782_v58 }
 0x1a4   :  { %v900_v1 = vpop.f32.mrb[17].mxu0  ;;  %v980_v2 = vpop.f32.mrb[17].mxu1 }
 0x1a5   :  { %v901_v27 = vadd.f32 %v900_v1, %v899_v10  ;;  %v981_v35 = vadd.f32 %v980_v2, %v979_v11  ;;  %v783_v38 = vmul.f32 0.001953125, %v518_v61 }
 0x1a7   :  { %v523_v3 = vadd.f32 %v981_v35, %v901_v27  ;;  %v902_v7 = vpop.f32.mrb[18].mxu0  ;;  %v982_v44 = vpop.f32.mrb[18].mxu1  ;;  %799 = vst [vmem:[#allocation7 + $0x38] sm:$0xff] %v783_v38  ;;  %v593_v38 = vld [vmem:[#allocation8] sm:$0x1] }
 0x1a8   :  { %v903_v48 = vpop.f32.mrb[19].mxu0  ;;  %v983_v8 = vpop.f32.mrb[19].mxu1 }
 0x1a9   :  { %v904_v18 = vadd.f32 %v903_v48, %v902_v7  ;;  %v984_v24 = vadd.f32 %v983_v8, %v982_v44  ;;  %v784_v12 = vmul.f32 0.001953125, %v523_v3 }
 0x1ab   :  { %v528_v13 = vadd.f32 %v984_v24, %v904_v18  ;;  %v905_v17 = vpop.f32.mrb[20].mxu0  ;;  %v985_v19 = vpop.f32.mrb[20].mxu1  ;;  %800 = vst [vmem:[#allocation7 + $0x40] sm:$0xff] %v784_v12 }
 0x1ac   :  { %v906_v6 = vpop.f32.mrb[21].mxu0  ;;  %v986_v20 = vpop.f32.mrb[21].mxu1 }
 0x1ad   :  { %v907_v53 = vadd.f32 %v906_v6, %v905_v17  ;;  %v987_v21 = vadd.f32 %v986_v20, %v985_v19  ;;  %v785_v29 = vmul.f32 0.001953125, %v528_v13 }
 0x1af   :  { %v533_v30 = vadd.f32 %v987_v21, %v907_v53  ;;  %v908_v32 = vpop.f32.mrb[22].mxu0  ;;  %v988_v33 = vpop.f32.mrb[22].mxu1  ;;  %801 = vst [vmem:[#allocation7 + $0x48] sm:$0xff] %v785_v29 }
 0x1b0   :  { %v909_v16 = vpop.f32.mrb[23].mxu0  ;;  %v989_v37 = vpop.f32.mrb[23].mxu1 }
 0x1b1   :  { %v910_v39 = vadd.f32 %v909_v16, %v908_v32  ;;  %v990_v41 = vadd.f32 %v989_v37, %v988_v33  ;;  %v786_v43 = vmul.f32 0.001953125, %v533_v30 }
 0x1b3   :  { %v538_v52 = vadd.f32 %v990_v41, %v910_v39  ;;  %v911_v55 = vpop.f32.mrb[24].mxu0  ;;  %v991_v14 = vpop.f32.mrb[24].mxu1  ;;  %802 = vst [vmem:[#allocation7 + $0x50] sm:$0xff] %v786_v43 }
 0x1b4   :  { %v912_v15 = vpop.f32.mrb[25].mxu0  ;;  %v992_v22 = vpop.f32.mrb[25].mxu1 }
 0x1b5   :  { %v913_v23 = vadd.f32 %v912_v15, %v911_v55  ;;  %v993_v59 = vadd.f32 %v992_v22, %v991_v14  ;;  %v787_v5 = vmul.f32 0.001953125, %v538_v52 }
 0x1b7   :  { %v543_v26 = vadd.f32 %v993_v59, %v913_v23  ;;  %v914_v28 = vpop.f32.mrb[26].mxu0  ;;  %v994_v34 = vpop.f32.mrb[26].mxu1  ;;  %803 = vst [vmem:[#allocation7 + $0x58] sm:$0xff] %v787_v5 }
 0x1b8   :  { %v915_v36 = vpop.f32.mrb[27].mxu0  ;;  %v995_v9 = vpop.f32.mrb[27].mxu1 }
 0x1b9   :  { %v916_v25 = vadd.f32 %v915_v36, %v914_v28  ;;  %v996_v40 = vadd.f32 %v995_v9, %v994_v34  ;;  %v788_v42 = vmul.f32 0.001953125, %v543_v26 }
 0x1bb   :  { %v548_v49 = vadd.f32 %v996_v40, %v916_v25  ;;  %v917_v50 = vpop.f32.mrb[28].mxu0  ;;  %v997_v46 = vpop.f32.mrb[28].mxu1  ;;  %804 = vst [vmem:[#allocation7 + $0x60] sm:$0xff] %v788_v42 }
 0x1bc   :  { %v918_v47 = vpop.f32.mrb[29].mxu0  ;;  %v998_v51 = vpop.f32.mrb[29].mxu1 }
 0x1bd   :  { %v919_v54 = vadd.f32 %v918_v47, %v917_v50  ;;  %v999_v56 = vadd.f32 %v998_v51, %v997_v46  ;;  %v789_v31 = vmul.f32 0.001953125, %v548_v49 }
 0x1bf   :  { %v553_v45 = vadd.f32 %v999_v56, %v919_v54  ;;  %v920_v62 = vpop.f32.mrb[30].mxu0  ;;  %v1000_v0 = vpop.f32.mrb[30].mxu1  ;;  %805 = vst [vmem:[#allocation7 + $0x68] sm:$0xff] %v789_v31 }
 0x1c0   :  { %v921_v57 = vpop.f32.mrb[31].mxu0  ;;  %v1001_v60 = vpop.f32.mrb[31].mxu1 }
 0x1c1   :  { %v922_v63 = vadd.f32 %v921_v57, %v920_v62  ;;  %v1002_v4 = vadd.f32 %v1001_v60, %v1000_v0  ;;  %v790_v58 = vmul.f32 0.001953125, %v553_v45 }
 0x1c3   :  { %v558_v61 = vadd.f32 %v1002_v4, %v922_v63  ;;  %v1035_v10 = vpop.f32.mrb[32].mxu0  ;;  %v1070_v11 = vpop.f32.mrb[32].mxu1  ;;  %806 = vst [vmem:[#allocation7 + $0x70] sm:$0xff] %v790_v58 }
 0x1c4   :  { %v1036_v1 = vpop.f32.mrb[33].mxu0  ;;  %v1071_v2 = vpop.f32.mrb[33].mxu1 }
 0x1c5   :  { %v1037_v27 = vadd.f32 %v1036_v1, %v1035_v10  ;;  %v1072_v35 = vadd.f32 %v1071_v2, %v1070_v11  ;;  %v791_v3 = vmul.f32 0.001953125, %v558_v61 }
 0x1c7   :  { %v752_v7 = vadd.f32 %v1072_v35, %v1037_v27  ;;  %807 = vst [vmem:[#allocation7 + $0x78] sm:$0xff] %v791_v3 }
 0x1c9   :  { %v755_v44 = vadd.f32 %v752_v7, %v593_v38 }
 0x1ca   :  { %1487 = shalt.err (!%p1484_p6)
}
 0x1cb   :  { %s1488_s14 = scalar_lea.hbm %s1863_s2, 2048 }
 0x1cc   :  { %p1489_p7 = scmp.ne.s32.totalorder %s1863_s2, %s1488_s14  ;;  %p1492_p8 = scmp.lt.u32.totalorder %s1488_s14, %s1863_s2 }
 0x1ce   :  { %p1494_p9 = pnand %p1492_p8, %p1489_p7 }
 0x1d0   :  { %1497 = shalt.err (!%p1494_p9)
}
 0x1d1   :  { %822 = dma.vmem_to_hbm [thread:$0]  %s817_s10, 2048, %s1863_s2, [#allocation4], %s1529_s22, %s1529_s22, %s1530_s23   ;;  %756 = vst [vmem:[#allocation8] sm:$0x1] %v755_v44 }
 0x1d2   :  { %s1534_s21 = smov [#allocation8]  }
 0x1d3   :  { %s829_s24 = sshll.u32 %s1534_s21, 4  ;;  %s830_s24 = int_to_ptr.vmem [resolvable:$true] %s829_s24 }
 0x1d4   :  { %s1498_s25 = scalar_lea.vmem %s830_s24, 16  ;;  %s1502_s26 = scalar_lea.vmem %s830_s24, 32 }
 0x1d5   :  { %p1499_p10 = scmp.ne.s32.totalorder %s830_s24, %s1498_s25  ;;  %p1503_p11 = scmp.lt.s32.totalorder %s830_s24, %s830_s24 }
 0x1d6   :  { %p1504_p12 = scmp.lt.s32.totalorder %s1502_s26, %s1498_s25 }
 0x1d8   :  { %v808_v48 = vld [vmem:[#allocation8] sm:$0x1]  ;;  %p1505_p13 = por %p1504_p12, %p1503_p11 }
 0x1d9   :  { %v809_v8 = vmul.f32 0.001953125, %v808_v48 }
 0x1da   :  { %p1506_p0 = pnand %p1505_p13, %p1499_p10 }
 0x1db   :  { %810 = vst [vmem:[#allocation8] sm:$0x1] %v809_v8 }
 0x1dc   :  { %1509 = shalt.err (!%p1506_p0)
}
 0x1dd   :  { %s1510_s29 = scalar_lea.hbm %s1864_s3, 16 }
 0x1de   :  { %p1511_p1 = scmp.ne.s32.totalorder %s1864_s3, %s1510_s29  ;;  %p1514_p2 = scmp.lt.u32.totalorder %s1510_s29, %s1864_s3 }
 0x1e0   :  { %p1516_p3 = pnand %p1514_p2, %p1511_p1 }
 0x1e2   :  { %1519 = shalt.err (!%p1516_p3)
}
 0x1e3   :  { %832 = dma.vmem_to_hbm [thread:$0]  %s830_s24, 16, %s1864_s3, [#allocation9]  }
 0x1e4   :  { %1524 = dma.done.wait [#allocation4], 2048  }
 0x1e5   :  { %1525 = vsyncadd [#allocation4], 4294965248 }
 0x1e6   :  { %1526 = dma.done.wait [#allocation9], 16  }
 0x1e7   :  { %1527 = vsyncadd [#allocation9], 4294967280 }
 0x1e8   :  { %839 = vsyncpa [#allocation3], 1 }
 0x1e9   :  { %840 = vsyncpa [#allocation6], 1 }
 0x1ea   :  { %841 = vsyncpa [#allocation4], 1 }
 0x1eb   :  { %842 = vsyncpa [#allocation9], 1 }

</bundles_post_ra>
